<compile_context>
chip_gen: v7x
topology: tpu7x:2x2x1
jax: 0.10.0
libtpu: 0.0.40
codegen_flags: <defaults>
</compile_context>

<pallas_src>
import jax
import jax.numpy as jnp
from jax.experimental import pallas as pl
from jax.experimental.pallas import tpu as pltpu


def mlp3_kernel(x_ref, w1_ref, b1_ref, w2_ref, b2_ref, w3_ref, b3_ref, o_ref):
    # Three back-to-back MXU matmuls; intermediates never leave the core.
    h = jnp.dot(x_ref[...], w1_ref[...],
                preferred_element_type=jnp.float32) + b1_ref[...]
    h = jnp.dot(h, w2_ref[...],
                preferred_element_type=jnp.float32) + b2_ref[...]
    h = jnp.dot(h, w3_ref[...],
                preferred_element_type=jnp.float32) + b3_ref[...]
    o_ref[...] = h.astype(o_ref.dtype)


def _round_up(n, m):
    return ((n + m - 1) // m) * m


def mlp3(x, w1, b1, w2, b2, w3, b3):
    """x: (B, 10) f32; w_i: (in, out) f32; b_i: (1, out) f32. Returns (B, 40) f32."""
    B, d_in = x.shape
    d1, d2, d3 = w1.shape[1], w2.shape[1], w3.shape[1]

    LANE = 128
    d_in_p = _round_up(d_in, LANE)
    d1_p = _round_up(d1, LANE)
    d2_p = _round_up(d2, LANE)
    d3_p = _round_up(d3, LANE)

    # Batch tile: multiple of 8 sublanes; up to 512 rows per grid step for large B
    # (x tile + out tile double-buffered in f32 stays well under the VMEM limit).
    TB = min(512, _round_up(B, 8))
    B_pad = _round_up(B, TB)

    def pad2(a, rows, cols):
        return jnp.pad(a, ((0, rows - a.shape[0]), (0, cols - a.shape[1])))

    # Zero padding is exact: padded columns/rows contribute nothing to the matmuls.
    x_p = pad2(x, B_pad, d_in_p)
    w1_p = pad2(w1, d_in_p, d1_p)
    w2_p = pad2(w2, d1_p, d2_p)
    w3_p = pad2(w3, d2_p, d3_p)
    b1_p = pad2(b1, 1, d1_p)
    b2_p = pad2(b2, 1, d2_p)
    b3_p = pad2(b3, 1, d3_p)

    flops = 2 * B * (d_in * d1 + d1 * d2 + d2 * d3)
    bytes_accessed = 4 * (
        x_p.size
        + w1_p.size + w2_p.size + w3_p.size
        + b1_p.size + b2_p.size + b3_p.size
        + B_pad * d3_p
    )

    grid = (B_pad // TB,)
    out_p = pl.pallas_call(
        mlp3_kernel,
        out_shape=jax.ShapeDtypeStruct((B_pad, d3_p), jnp.float32),
        grid=grid,
        in_specs=[
            pl.BlockSpec((TB, d_in_p), lambda i: (i, 0)),    # x tile, pipelined
            pl.BlockSpec((d_in_p, d1_p), lambda i: (0, 0)),  # weights: VMEM-resident
            pl.BlockSpec((1, d1_p), lambda i: (0, 0)),
            pl.BlockSpec((d1_p, d2_p), lambda i: (0, 0)),
            pl.BlockSpec((1, d2_p), lambda i: (0, 0)),
            pl.BlockSpec((d2_p, d3_p), lambda i: (0, 0)),
            pl.BlockSpec((1, d3_p), lambda i: (0, 0)),
        ],
        out_specs=pl.BlockSpec((TB, d3_p), lambda i: (i, 0)),
        compiler_params=pltpu.CompilerParams(
            dimension_semantics=("parallel",)),
        cost_estimate=pl.CostEstimate(
            flops=flops, transcendentals=0, bytes_accessed=bytes_accessed),
    )(x_p, w1_p, b1_p, w2_p, b2_p, w3_p, b3_p)

    # Slice the lane-dense padded result back to the logical shape.
    return out_p[:B, :d3]


def init_linear(key, in_f, out_f):
    # Deterministic init mirroring PyTorch's default uniform(-1/sqrt(in), 1/sqrt(in)).
    kw, kb = jax.random.split(key)
    bound = 1.0 / jnp.sqrt(float(in_f))
    w = jax.random.uniform(kw, (in_f, out_f), jnp.float32, -bound, bound)
    b = jax.random.uniform(kb, (1, out_f), jnp.float32, -bound, bound)
    return w, b


if __name__ == "__main__":
    key = jax.random.PRNGKey(0)
    kx, k1, k2, k3 = jax.random.split(key, 4)

    x = jax.random.normal(kx, (2, 10), jnp.float32)
    w1, b1 = init_linear(k1, 10, 20)
    w2, b2 = init_linear(k2, 20, 30)
    w3, b3 = init_linear(k3, 30, 40)

    out = mlp3(x, w1, b1, w2, b2, w3, b3)
    jax.block_until_ready(out)

    # Reference check in plain f32 JAX (kernel is f32 end-to-end).
    ref = ((x @ w1 + b1) @ w2 + b2) @ w3 + b3
    assert out.shape == (2, 40)
    assert jnp.allclose(out, ref, atol=1e-4, rtol=1e-4), float(
        jnp.max(jnp.abs(out - ref)))

    print("KERNEL_OK")
</pallas_src>

<mosaic_0001>
module attributes {stable_mosaic.version = 11 : i64} {
  func.func @mlp3_kernel(%arg0: i32, %arg1: memref<8x128xf32, #tpu.memory_space<vmem>>, %arg2: memref<128x128xf32, #tpu.memory_space<vmem>>, %arg3: memref<1x128xf32, #tpu.memory_space<vmem>>, %arg4: memref<128x128xf32, #tpu.memory_space<vmem>>, %arg5: memref<1x128xf32, #tpu.memory_space<vmem>>, %arg6: memref<128x128xf32, #tpu.memory_space<vmem>>, %arg7: memref<1x128xf32, #tpu.memory_space<vmem>>, %arg8: memref<8x128xf32, #tpu.memory_space<vmem>>) attributes {dimension_semantics = [#tpu.dimension_semantics<parallel>], iteration_bounds = array<i64: 1>, scalar_prefetch = 0 : i64, scratch_operands = 0 : i64, tpu.core_type = #tpu.core_type<tc>, window_params = [{transform_indices = @transform_0, window_bounds = array<i64: 8, 128>}, {pipeline_mode = #tpu.pipeline_mode<synchronous>, transform_indices = @transform_1, window_bounds = array<i64: 128, 128>}, {pipeline_mode = #tpu.pipeline_mode<synchronous>, transform_indices = @transform_2, window_bounds = array<i64: 1, 128>}, {pipeline_mode = #tpu.pipeline_mode<synchronous>, transform_indices = @transform_3, window_bounds = array<i64: 128, 128>}, {pipeline_mode = #tpu.pipeline_mode<synchronous>, transform_indices = @transform_4, window_bounds = array<i64: 1, 128>}, {pipeline_mode = #tpu.pipeline_mode<synchronous>, transform_indices = @transform_5, window_bounds = array<i64: 128, 128>}, {pipeline_mode = #tpu.pipeline_mode<synchronous>, transform_indices = @transform_6, window_bounds = array<i64: 1, 128>}, {transform_indices = @transform_7, window_bounds = array<i64: 8, 128>}]} {
    %c0 = arith.constant 0 : index
    %c0_0 = arith.constant 0 : index
    %0 = vector.load %arg1[%c0, %c0_0] : memref<8x128xf32, #tpu.memory_space<vmem>>, vector<8x128xf32>
    %c0_1 = arith.constant 0 : index
    %c0_2 = arith.constant 0 : index
    %1 = vector.load %arg2[%c0_1, %c0_2] : memref<128x128xf32, #tpu.memory_space<vmem>>, vector<128x128xf32>
    %cst = arith.constant dense<0.000000e+00> : vector<8x128xf32>
    %2 = tpu.matmul %0, %1, %cst {dimension_numbers = #tpu.dot_dimension_numbers<[1], [0], [0], [1], [0, 0, 1, 1], [], []>} : vector<8x128xf32>, vector<128x128xf32>, vector<8x128xf32> -> vector<8x128xf32>
    %c0_3 = arith.constant 0 : index
    %c0_4 = arith.constant 0 : index
    %3 = vector.load %arg3[%c0_3, %c0_4] : memref<1x128xf32, #tpu.memory_space<vmem>>, vector<1x128xf32>
    %4 = vector.broadcast %3 : vector<1x128xf32> to vector<8x128xf32>
    %5 = arith.addf %2, %4 : vector<8x128xf32>
    %c0_5 = arith.constant 0 : index
    %c0_6 = arith.constant 0 : index
    %6 = vector.load %arg4[%c0_5, %c0_6] : memref<128x128xf32, #tpu.memory_space<vmem>>, vector<128x128xf32>
    %cst_7 = arith.constant dense<0.000000e+00> : vector<8x128xf32>
    %7 = tpu.matmul %5, %6, %cst_7 {dimension_numbers = #tpu.dot_dimension_numbers<[1], [0], [0], [1], [0, 0, 1, 1], [], []>} : vector<8x128xf32>, vector<128x128xf32>, vector<8x128xf32> -> vector<8x128xf32>
    %c0_8 = arith.constant 0 : index
    %c0_9 = arith.constant 0 : index
    %8 = vector.load %arg5[%c0_8, %c0_9] : memref<1x128xf32, #tpu.memory_space<vmem>>, vector<1x128xf32>
    %9 = vector.broadcast %8 : vector<1x128xf32> to vector<8x128xf32>
    %10 = arith.addf %7, %9 : vector<8x128xf32>
    %c0_10 = arith.constant 0 : index
    %c0_11 = arith.constant 0 : index
    %11 = vector.load %arg6[%c0_10, %c0_11] : memref<128x128xf32, #tpu.memory_space<vmem>>, vector<128x128xf32>
    %cst_12 = arith.constant dense<0.000000e+00> : vector<8x128xf32>
    %12 = tpu.matmul %10, %11, %cst_12 {dimension_numbers = #tpu.dot_dimension_numbers<[1], [0], [0], [1], [0, 0, 1, 1], [], []>} : vector<8x128xf32>, vector<128x128xf32>, vector<8x128xf32> -> vector<8x128xf32>
    %c0_13 = arith.constant 0 : index
    %c0_14 = arith.constant 0 : index
    %13 = vector.load %arg7[%c0_13, %c0_14] : memref<1x128xf32, #tpu.memory_space<vmem>>, vector<1x128xf32>
    %14 = vector.broadcast %13 : vector<1x128xf32> to vector<8x128xf32>
    %15 = arith.addf %12, %14 : vector<8x128xf32>
    %c0_15 = arith.constant 0 : index
    %c0_16 = arith.constant 0 : index
    %16 = vector.load %arg8[%c0_15, %c0_16] : memref<8x128xf32, #tpu.memory_space<vmem>>, vector<8x128xf32>
    tpu.vector_store %arg8[%c0_15, %c0_16], %15 {strides = array<i32>} : memref<8x128xf32, #tpu.memory_space<vmem>>, vector<8x128xf32>,
    return
  }
  func.func @transform_0(%arg0: i32) -> (i32, i32) {
    %c0_i32 = arith.constant 0 : i32
    %c0_i32_0 = arith.constant 0 : i32
    return %arg0, %c0_i32 : i32, i32
  }
  func.func @transform_1(%arg0: i32) -> (i32, i32) {
    %c0_i32 = arith.constant 0 : i32
    %c0_i32_0 = arith.constant 0 : i32
    %c0_i32_1 = arith.constant 0 : i32
    return %c0_i32, %c0_i32_0 : i32, i32
  }
  func.func @transform_2(%arg0: i32) -> (i32, i32) {
    %c0_i32 = arith.constant 0 : i32
    %c0_i32_0 = arith.constant 0 : i32
    %c0_i32_1 = arith.constant 0 : i32
    return %c0_i32, %c0_i32_0 : i32, i32
  }
  func.func @transform_3(%arg0: i32) -> (i32, i32) {
    %c0_i32 = arith.constant 0 : i32
    %c0_i32_0 = arith.constant 0 : i32
    %c0_i32_1 = arith.constant 0 : i32
    return %c0_i32, %c0_i32_0 : i32, i32
  }
  func.func @transform_4(%arg0: i32) -> (i32, i32) {
    %c0_i32 = arith.constant 0 : i32
    %c0_i32_0 = arith.constant 0 : i32
    %c0_i32_1 = arith.constant 0 : i32
    return %c0_i32, %c0_i32_0 : i32, i32
  }
  func.func @transform_5(%arg0: i32) -> (i32, i32) {
    %c0_i32 = arith.constant 0 : i32
    %c0_i32_0 = arith.constant 0 : i32
    %c0_i32_1 = arith.constant 0 : i32
    return %c0_i32, %c0_i32_0 : i32, i32
  }
  func.func @transform_6(%arg0: i32) -> (i32, i32) {
    %c0_i32 = arith.constant 0 : i32
    %c0_i32_0 = arith.constant 0 : i32
    %c0_i32_1 = arith.constant 0 : i32
    return %c0_i32, %c0_i32_0 : i32, i32
  }
  func.func @transform_7(%arg0: i32) -> (i32, i32) {
    %c0_i32 = arith.constant 0 : i32
    %c0_i32_0 = arith.constant 0 : i32
    return %arg0, %c0_i32 : i32, i32
  }
}

</mosaic_0001>

<bundles_post_ra>
// kernel: tpu_custom_call.1
= control target key start
LH: loop header
LB: loop body
LE: loop exit
PB: predicated region body
PF: predicated region fallthrough
CT: control target
= control target key end

     0   :  { %12 = vsyncpa [#allocation3], 0  ;;  %s895_s0 = inlined_call_operand.hbm [shape: f32[8,128], index: 0, kind: input, shape index: {}]   ;;  %s896_s1 = inlined_call_operand.hbm [shape: f32[128,128], index: 1, kind: input, shape index: {}]   ;;  %s897_s2 = inlined_call_operand.vmem [shape: f32[1,128], index: 2, kind: input, shape index: {}]   ;;  %s898_s3 = inlined_call_operand.hbm [shape: f32[128,128], index: 3, kind: input, shape index: {}]   ;;  %s899_s4 = inlined_call_operand.vmem [shape: f32[1,128], index: 4, kind: input, shape index: {}]   ;;  %s900_s5 = inlined_call_operand.hbm [shape: f32[128,128], index: 5, kind: input, shape index: {}]   ;;  %s901_s6 = inlined_call_operand.vmem [shape: f32[1,128], index: 6, kind: input, shape index: {}]   ;;  %s902_s7 = inlined_call_operand.hbm [shape: f32[8,128], index: 7, kind: output, shape index: {}]  }
   0x1   :  { %13 = vsyncpa [#allocation6], 0 }
   0x2   :  { %14 = vsyncpa [#allocation9], 0 }
   0x3   :  { %15 = vsyncpa [#allocation4], 0  ;;  %s737_s24 = smov [#allocation5]   ;;  %s619_s28 = scalar_lea.hbm %s896_s1, 2048 }
   0x4   :  { %s31_s25 = sshll.u32 %s737_s24, 4  ;;  %p620_p0 = scmp.ne.s32.totalorder %s896_s1, %s619_s28  ;;  %s32_s25 = int_to_ptr.vmem [resolvable:$true] %s31_s25 }
   0x5   :  { %p623_p1 = scmp.lt.u32.totalorder %s619_s28, %s896_s1 }
   0x7   :  { %p625_p2 = pnand %p623_p1, %p620_p0 }
   0x9   :  { %628 = shalt.err (!%p625_p2)
}
   0xa   :  { %s629_s10 = scalar_lea.vmem %s32_s25, 2048  ;;  %p634_p4 = scmp.lt.s32.totalorder %s32_s25, %s32_s25 }
   0xb   :  { %p630_p3 = scmp.ne.s32.totalorder %s32_s25, %s629_s10  ;;  %p635_p5 = scmp.lt.s32.totalorder %s629_s10, %s629_s10 }
   0xd   :  { %p636_p6 = por %p635_p5, %p634_p4 }
   0xf   :  { %p637_p7 = pnand %p636_p6, %p630_p3 }
  0x11   :  { %640 = shalt.err (!%p637_p7)
}
  0x12   :  { %s738_s11 = smov 128   ;;  %s739_s12 = smov 8  }
  0x13   :  { %37 = dma.hbm_to_vmem [thread:$0]  %s896_s1, 2048, %s32_s25, [#allocation6], %s738_s11, %s738_s11, %s739_s12  }
  0x14   :  { %s740_s15 = smov [#allocation2]   ;;  %s741_s17 = smov [#allocation7]  }
  0x15   :  { %s22_s16 = sshll.u32 %s740_s15, 4  ;;  %s45_s18 = sshll.u32 %s741_s17, 4  ;;  %s23_s16 = int_to_ptr.vmem [resolvable:$true] %s22_s16  ;;  %s46_s18 = int_to_ptr.vmem [resolvable:$true] %s45_s18 }
  0x16   :  { %s641_s21 = scalar_lea.hbm %s895_s0, 128 }
  0x17   :  { %p642_p8 = scmp.ne.s32.totalorder %s895_s0, %s641_s21  ;;  %p645_p9 = scmp.lt.u32.totalorder %s641_s21, %s895_s0 }
  0x19   :  { %p647_p10 = pnand %p645_p9, %p642_p8 }
  0x1b   :  { %650 = shalt.err (!%p647_p10)
}
  0x1c   :  { %s651_s1 = scalar_lea.vmem %s23_s16, 128  ;;  %p656_p12 = scmp.lt.s32.totalorder %s23_s16, %s23_s16 }
  0x1d   :  { %p652_p11 = scmp.ne.s32.totalorder %s23_s16, %s651_s1  ;;  %p657_p13 = scmp.lt.s32.totalorder %s651_s1, %s651_s1 }
  0x1f   :  { %p658_p0 = por %p657_p13, %p656_p12 }
  0x21   :  { %p659_p1 = pnand %p658_p0, %p652_p11 }
  0x23   :  { %662 = shalt.err (!%p659_p1)
}
  0x24   :  { %25 = dma.hbm_to_vmem [thread:$0]  %s895_s0, 128, %s23_s16, [#allocation3]  }
  0x25   :  { %s663_s30 = scalar_lea.hbm %s898_s3, 2048 }
  0x26   :  { %p664_p2 = scmp.ne.s32.totalorder %s898_s3, %s663_s30  ;;  %p667_p3 = scmp.lt.u32.totalorder %s663_s30, %s898_s3 }
  0x28   :  { %p669_p4 = pnand %p667_p3, %p664_p2 }
  0x2a   :  { %672 = shalt.err (!%p669_p4)
}
  0x2b   :  { %s673_s14 = scalar_lea.vmem %s46_s18, 2048  ;;  %p678_p6 = scmp.lt.s32.totalorder %s46_s18, %s46_s18 }
  0x2c   :  { %p674_p5 = scmp.ne.s32.totalorder %s46_s18, %s673_s14  ;;  %p679_p7 = scmp.lt.s32.totalorder %s673_s14, %s673_s14 }
  0x2e   :  { %p680_p8 = por %p679_p7, %p678_p6 }
  0x30   :  { %p681_p9 = pnand %p680_p8, %p674_p5 }
  0x32   :  { %684 = shalt.err (!%p681_p9)
}
  0x33   :  { %51 = dma.hbm_to_vmem [thread:$0]  %s898_s3, 2048, %s46_s18, [#allocation6], %s738_s11, %s738_s11, %s739_s12  }
  0x34   :  { %s742_s16 = smov [#allocation8]   ;;  %s685_s21 = scalar_lea.hbm %s900_s5, 2048 }
  0x35   :  { %s59_s17 = sshll.u32 %s742_s16, 4  ;;  %p686_p10 = scmp.ne.s32.totalorder %s900_s5, %s685_s21  ;;  %s60_s17 = int_to_ptr.vmem [resolvable:$true] %s59_s17 }
  0x36   :  { %p689_p11 = scmp.lt.u32.totalorder %s685_s21, %s900_s5 }
  0x38   :  { %p691_p12 = pnand %p689_p11, %p686_p10 }
  0x3a   :  { %694 = shalt.err (!%p691_p12)
}
  0x3b   :  { %s695_s1 = scalar_lea.vmem %s60_s17, 2048  ;;  %p700_p0 = scmp.lt.s32.totalorder %s60_s17, %s60_s17 }
  0x3c   :  { %p696_p13 = scmp.ne.s32.totalorder %s60_s17, %s695_s1  ;;  %p701_p1 = scmp.lt.s32.totalorder %s695_s1, %s695_s1 }
  0x3e   :  { %p702_p2 = por %p701_p1, %p700_p0 }
  0x40   :  { %p703_p3 = pnand %p702_p2, %p696_p13 }
  0x42   :  { %706 = shalt.err (!%p703_p3)
}
  0x43   :  { %65 = dma.hbm_to_vmem [thread:$0]  %s900_s5, 2048, %s60_s17, [#allocation9], %s738_s11, %s738_s11, %s739_s12  }
  0x44   :  { %729 = dma.done.wait [#allocation3], 128  }
  0x45   :  { %730 = vsyncadd [#allocation3], 4294967168 }
  0x46   :  { %731 = dma.done.wait [#allocation6], 4096  }
  0x47   :  { %732 = vsyncadd [#allocation6], 4294963200 }
  0x48   :  { %733 = dma.done.wait [#allocation9], 2048  }
  0x49   :  { %734 = vsyncadd [#allocation9], 4294965248  ;;  %v743_v0 = vmov 0.0|0.0   ;;  %vm744_vm0 = vmmov 0   ;;  %v745_v1 = vmov 0.0   ;;  %v81_v2 = vld [vmem:[#allocation5] sm:$0xff] }
  0x4a   :  { %537 = vmatprep.subr.bf16.mxu0 %v743_v0  ;;  %464 = vmatprep.mubr.msk.f32.mxu0 %vm744_vm0, %v745_v1  ;;  %v82_v3 = vld [vmem:[#allocation5 + $0x8] sm:$0xff]  ;;  %v83_v4 = vld [vmem:[#allocation5 + $0x10] sm:$0xff]  ;;  %v84_v6 = vld [vmem:[#allocation5 + $0x18] sm:$0xff] }
  0x4b   :  { %561 = vmatprep.subr.bf16.mxu1 %v743_v0  ;;  %499 = vmatprep.mubr.msk.f32.mxu1 %vm744_vm0, %v745_v1  ;;  %v538_v5 = vpack.c.bf16 %v82_v3, %v81_v2  ;;  %v541_v7 = vpack.c.bf16 %v84_v6, %v83_v4  ;;  %v85_v8 = vld [vmem:[#allocation5 + $0x20] sm:$0xff]  ;;  %v86_v9 = vld [vmem:[#allocation5 + $0x28] sm:$0xff]  ;;  %v176_v12 = vld [vmem:[#allocation7 + $0x10] sm:$0xff] }
  0x4c   :  { %v174_v10 = vld [vmem:[#allocation7] sm:$0xff]  ;;  %v175_v11 = vld [vmem:[#allocation7 + $0x8] sm:$0xff]  ;;  %v177_v13 = vld [vmem:[#allocation7 + $0x18] sm:$0xff]  ;;  %v544_v14 = vpack.c.bf16 %v86_v9, %v85_v8 }
  0x4d   :  { %539 = vmatpush3.bf16.msra.mxu0 %v538_v5  ;;  %v562_v15 = vpack.c.bf16 %v175_v11, %v174_v10  ;;  %v87_v16 = vld [vmem:[#allocation5 + $0x30] sm:$0xff]  ;;  %v88_v17 = vld [vmem:[#allocation5 + $0x38] sm:$0xff]  ;;  %v565_v18 = vpack.c.bf16 %v177_v13, %v176_v12  ;;  %v178_v19 = vld [vmem:[#allocation7 + $0x20] sm:$0xff] }
  0x4e   :  { %540 = vmatprep.subr.bf16.mxu0 %v743_v0  ;;  %v179_v20 = vld [vmem:[#allocation7 + $0x28] sm:$0xff]  ;;  %v547_v21 = vpack.c.bf16 %v88_v17, %v87_v16  ;;  %v89_v22 = vld [vmem:[#allocation5 + $0x40] sm:$0xff]  ;;  %v180_v25 = vld [vmem:[#allocation7 + $0x30] sm:$0xff] }
  0x4f   :  { %563 = vmatpush3.bf16.msra.mxu1 %v562_v15  ;;  %v90_v23 = vld [vmem:[#allocation5 + $0x48] sm:$0xff]  ;;  %v568_v24 = vpack.c.bf16 %v179_v20, %v178_v19  ;;  %v181_v26 = vld [vmem:[#allocation7 + $0x38] sm:$0xff]  ;;  %v91_v28 = vld [vmem:[#allocation5 + $0x50] sm:$0xff] }
  0x50   :  { %564 = vmatprep.subr.bf16.mxu1 %v743_v0  ;;  %v550_v27 = vpack.c.bf16 %v90_v23, %v89_v22  ;;  %v92_v29 = vld [vmem:[#allocation5 + $0x58] sm:$0xff]  ;;  %v571_v30 = vpack.c.bf16 %v181_v26, %v180_v25  ;;  %v182_v31 = vld [vmem:[#allocation7 + $0x40] sm:$0xff]  ;;  %v183_v32 = vld [vmem:[#allocation7 + $0x48] sm:$0xff] }
  0x51   :  { %542 = vmatpush3.bf16.msra.mxu0 %v541_v7  ;;  %v553_v33 = vpack.c.bf16 %v92_v29, %v91_v28  ;;  %v93_v34 = vld [vmem:[#allocation5 + $0x60] sm:$0xff]  ;;  %v94_v35 = vld [vmem:[#allocation5 + $0x68] sm:$0xff]  ;;  %v574_v36 = vpack.c.bf16 %v183_v32, %v182_v31  ;;  %v184_v37 = vld [vmem:[#allocation7 + $0x50] sm:$0xff] }
  0x52   :  { %543 = vmatprep.subr.bf16.mxu0 %v743_v0  ;;  %v185_v38 = vld [vmem:[#allocation7 + $0x58] sm:$0xff]  ;;  %v556_v39 = vpack.c.bf16 %v94_v35, %v93_v34  ;;  %v95_v40 = vld [vmem:[#allocation5 + $0x70] sm:$0xff]  ;;  %v186_v43 = vld [vmem:[#allocation7 + $0x60] sm:$0xff] }
  0x53   :  { %566 = vmatpush3.bf16.msra.mxu1 %v565_v18  ;;  %v96_v41 = vld [vmem:[#allocation5 + $0x78] sm:$0xff]  ;;  %v577_v42 = vpack.c.bf16 %v185_v38, %v184_v37  ;;  %v187_v44 = vld [vmem:[#allocation7 + $0x68] sm:$0xff]  ;;  %v188_v48 = vld [vmem:[#allocation7 + $0x70] sm:$0xff] }
  0x54   :  { %567 = vmatprep.subr.bf16.mxu1 %v743_v0  ;;  %v559_v45 = vpack.c.bf16 %v96_v41, %v95_v40  ;;  %v580_v46 = vpack.c.bf16 %v187_v44, %v186_v43  ;;  %v80_v47 = vld [vmem:[#allocation2] sm:$0xff]  ;;  %v267_v51 = vld [vmem:[#allocation8] sm:$0xff]  ;;  %v268_v52 = vld [vmem:[#allocation8 + $0x8] sm:$0xff] }
  0x55   :  { %545 = vmatpush3.bf16.msra.mxu0 %v544_v14  ;;  %v189_v49 = vld [vmem:[#allocation7 + $0x78] sm:$0xff]  ;;  %v269_v53 = vld [vmem:[#allocation8 + $0x10] sm:$0xff]  ;;  %v586_v54 = vpack.c.bf16 %v268_v52, %v267_v51  ;;  %v271_v57 = vld [vmem:[#allocation8 + $0x20] sm:$0xff] }
  0x56   :  { %546 = vmatprep.subr.bf16.mxu0 %v743_v0  ;;  %v583_v50 = vpack.c.bf16 %v189_v49, %v188_v48  ;;  %v270_v55 = vld [vmem:[#allocation8 + $0x18] sm:$0xff]  ;;  %v272_v58 = vld [vmem:[#allocation8 + $0x28] sm:$0xff]  ;;  %v273_v60 = vld [vmem:[#allocation8 + $0x30] sm:$0xff] }
  0x57   :  { %569 = vmatpush3.bf16.msra.mxu1 %v568_v24  ;;  %v589_v56 = vpack.c.bf16 %v270_v55, %v269_v53  ;;  %v592_v59 = vpack.c.bf16 %v272_v58, %v271_v57  ;;  %v274_v61 = vld [vmem:[#allocation8 + $0x38] sm:$0xff]  ;;  %v275_v63 = vld [vmem:[#allocation8 + $0x40] sm:$0xff]  ;;  %v277_v3 = vld [vmem:[#allocation8 + $0x50] sm:$0xff] }
  0x58   :  { %570 = vmatprep.subr.bf16.mxu1 %v743_v0  ;;  %v595_v62 = vpack.c.bf16 %v274_v61, %v273_v60  ;;  %v278_v4 = vld [vmem:[#allocation8 + $0x58] sm:$0xff]  ;;  %v279_v6 = vld [vmem:[#allocation8 + $0x60] sm:$0xff]  ;;  %v280_v7 = vld [vmem:[#allocation8 + $0x68] sm:$0xff] }
  0x59   :  { %548 = vmatpush3.bf16.msra.mxu0 %v547_v21  ;;  %v601_v5 = vpack.c.bf16 %v278_v4, %v277_v3  ;;  %v604_v8 = vpack.c.bf16 %v280_v7, %v279_v6  ;;  %v378_v9 = vld [vmem:[%s897_s2] ss:$0 sm:$0xff]  ;;  %v281_v13 = vld [vmem:[#allocation8 + $0x70] sm:$0xff]  ;;  %s746_s2 = smov [#allocation10]  }
  0x5a   :  { %549 = vmatprep.subr.bf16.mxu0 %v743_v0  ;;  %v282_v14 = vld [vmem:[#allocation8 + $0x78] sm:$0xff]  ;;  %s367_s29 = sshll.u32 %s746_s2, 4  ;;  %s368_s29 = int_to_ptr.vmem [resolvable:$true] %s367_s29 }
  0x5b   :  { %572 = vmatpush3.bf16.msra.mxu1 %v571_v30  ;;  %v607_v15 = vpack.c.bf16 %v282_v14, %v281_v13  ;;  %v379_v16 = vld [vmem:[%s899_s4] ss:$0 sm:$0xff]  ;;  %s707_s30 = scalar_lea.vmem %s368_s29, 128  ;;  %p712_p5 = scmp.lt.s32.totalorder %s368_s29, %s368_s29 }
  0x5c   :  { %573 = vmatprep.subr.bf16.mxu1 %v743_v0  ;;  %p708_p4 = scmp.ne.s32.totalorder %s368_s29, %s707_s30  ;;  %p713_p6 = scmp.lt.s32.totalorder %s707_s30, %s707_s30 }
  0x5d   :  { %551 = vmatpush3.bf16.msra.mxu0 %v550_v27 }
  0x5e   :  { %552 = vmatprep.subr.bf16.mxu0 %v743_v0  ;;  %p714_p7 = por %p713_p6, %p712_p5 }
  0x5f   :  { %575 = vmatpush3.bf16.msra.mxu1 %v574_v36 }
  0x60   :  { %576 = vmatprep.subr.bf16.mxu1 %v743_v0  ;;  %p715_p8 = pnand %p714_p7, %p708_p4 }
  0x61   :  { %554 = vmatpush3.bf16.msra.mxu0 %v553_v33 }
  0x62   :  { %555 = vmatprep.subr.bf16.mxu0 %v743_v0 }
  0x63   :  { %578 = vmatpush3.bf16.msra.mxu1 %v577_v42 }
  0x64   :  { %579 = vmatprep.subr.bf16.mxu1 %v743_v0 }
  0x65   :  { %557 = vmatpush3.bf16.msra.mxu0 %v556_v39 }
  0x66   :  { %558 = vmatprep.subr.bf16.mxu0 %v743_v0 }
  0x67   :  { %581 = vmatpush3.bf16.msra.mxu1 %v580_v46 }
  0x68   :  { %582 = vmatprep.subr.bf16.mxu1 %v743_v0 }
  0x69   :  { %560 = vmatpush3.bf16.msra.mxu0 %v559_v45 }
  0x6a   :  { %585 = vmatprep.subr.bf16.mxu0 %v743_v0 }
  0x6b   :  { %584 = vmatpush3.bf16.msra.mxu1 %v583_v50 }
  0x6c   :  { %465 = vmatmul.mubr.f32.vlgmr.msra.gmra.mrb[0].mxu0 %v80_v47 }
  0x6d   :  { %534 = vmatprep.mubr.msk.f32.mxu0 %vm744_vm0, %v745_v1  ;;  %587 = vmatpush3.bf16.msra.mxu0 %v586_v54  ;;  %v276_v1 = vld [vmem:[#allocation8 + $0x48] sm:$0xff] }
  0x6e   :  { %588 = vmatprep.subr.bf16.mxu0 %v743_v0  ;;  %v598_v2 = vpack.c.bf16 %v276_v1, %v275_v63 }
  0x71   :  { %590 = vmatpush3.bf16.msra.mxu0 %v589_v56 }
  0x72   :  { %591 = vmatprep.subr.bf16.mxu0 %v743_v0 }
  0x75   :  { %593 = vmatpush3.bf16.msra.mxu0 %v592_v59 }
  0x76   :  { %594 = vmatprep.subr.bf16.mxu0 %v743_v0 }
  0x79   :  { %596 = vmatpush3.bf16.msra.mxu0 %v595_v62 }
  0x7a   :  { %597 = vmatprep.subr.bf16.mxu0 %v743_v0 }
  0x7d   :  { %599 = vmatpush3.bf16.msra.mxu0 %v598_v2 }
  0x7e   :  { %600 = vmatprep.subr.bf16.mxu0 %v743_v0 }
  0x81   :  { %602 = vmatpush3.bf16.msra.mxu0 %v601_v5 }
  0x82   :  { %603 = vmatprep.subr.bf16.mxu0 %v743_v0 }
  0x85   :  { %605 = vmatpush3.bf16.msra.mxu0 %v604_v8 }
  0x86   :  { %606 = vmatprep.subr.bf16.mxu0 %v743_v0  ;;  %v380_v0 = vld [vmem:[%s901_s6] ss:$0 sm:$0xff] }
  0x89   :  { %608 = vmatpush3.bf16.msra.mxu0 %v607_v15 }
 0x13f   :  { %v170_v10 = vpop.f32.mrb[0].mxu0 }
 0x140   :  { %v171_v11 = vadd.f32 %v378_v9, %v170_v10  ;;  %v466_v12 = vpop.f32.mrb[1].mxu0 }
 0x142   :  { %500 = vmatmul.mubr.f32.vlgmr.msra.gmra.mrb[0].mxu1 %v171_v11 }
 0x215   :  { %v263_v17 = vpop.f32.mrb[0].mxu1 }
 0x216   :  { %v264_v18 = vadd.f32 %v379_v16, %v263_v17  ;;  %v501_v19 = vpop.f32.mrb[1].mxu1 }
 0x218   :  { %535 = vmatmul.mubr.f32.vlgmr.msra.gmra.mrb[2].mxu0 %v264_v18 }
 0x2eb   :  { %v356_v20 = vpop.f32.mrb[2].mxu0 }
 0x2ec   :  { %v357_v21 = vadd.f32 %v380_v0, %v356_v20  ;;  %v536_v22 = vpop.f32.mrb[3].mxu0 }
 0x2ee   :  { %360 = vst [vmem:[#allocation10] sm:$0xff] %v357_v21 }
 0x2ef   :  { %718 = shalt.err (!%p715_p8)
}
 0x2f0   :  { %s719_s9 = scalar_lea.hbm %s902_s7, 128 }
 0x2f1   :  { %p720_p9 = scmp.ne.s32.totalorder %s902_s7, %s719_s9  ;;  %p723_p10 = scmp.lt.u32.totalorder %s719_s9, %s902_s7 }
 0x2f3   :  { %p725_p11 = pnand %p723_p10, %p720_p9 }
 0x2f5   :  { %728 = shalt.err (!%p725_p11)
}
 0x2f6   :  { %370 = dma.vmem_to_hbm [thread:$0]  %s368_s29, 128, %s902_s7, [#allocation4]  }
 0x2f7   :  { %735 = dma.done.wait [#allocation4], 128  }
 0x2f8   :  { %736 = vsyncadd [#allocation4], 4294967168 }
 0x2f9   :  { %374 = vsyncpa [#allocation3], 1 }
 0x2fa   :  { %375 = vsyncpa [#allocation6], 1 }
 0x2fb   :  { %376 = vsyncpa [#allocation9], 1 }
 0x2fc   :  { %377 = vsyncpa [#allocation4], 1 }

</bundles_post_ra>
